<compile_context>
chip_gen: v6e
topology: v6e:2x2x1
jax: 0.10.0
libtpu: 0.0.40
codegen_flags: <defaults>
</compile_context>

<pallas_src>
import functools

import jax
import jax.numpy as jnp
from jax import lax
from jax.experimental import pallas as pl
from jax.experimental.pallas import tpu as pltpu

_LANE = 128
_VMEM_LIMIT_BYTES = 32 * 1024 * 1024
# Whole-sample path only when one sample (one input, one buffer) is <= 2 MiB:
# 2 inputs x 2 buffers x 2 MiB + chunk temps ~ 10 MiB, safe even on v5e's
# 16 MiB default scoped VMEM (and far under v7x's 64 MiB physical).
_SINGLE_PASS_MAX_SAMPLE_BYTES = 2 * 1024 * 1024


def _pick_divisor(m, target, prefer=8):
    """Largest divisor of m that is <= target, preferring multiples of `prefer`."""
    best = 1
    for d in range(min(m, target), 0, -1):
        if m % d == 0:
            if d == m or d % prefer == 0:
                return d
            if best == 1:
                best = d
    return best


# ---------------------------------------------------------------------------
# Path 1: whole sample resident in VMEM, chunked body (bounded f32 temps).
# ---------------------------------------------------------------------------
def _single_pass_kernel(x_ref, y_ref, o_ref, *, n_true, chunk, n_chunks):
    # x_ref / y_ref: (1, M, 128) = one full (flattened, zero-padded) sample.
    # o_ref: (1, 1, 1) f32 = this sample's sum(|x/m_x - y/m_y|).
    inv_n = jnp.float32(1.0 / n_true)

    def sums_body(i, carry):
        sx, sy = carry
        s = pl.multiple_of(i * chunk, chunk)
        xc = x_ref[0, pl.ds(s, chunk), :].astype(jnp.float32)
        yc = y_ref[0, pl.ds(s, chunk), :].astype(jnp.float32)
        return sx + jnp.sum(xc), sy + jnp.sum(yc)

    sx, sy = lax.fori_loop(0, n_chunks, sums_body,
                           (jnp.float32(0.0), jnp.float32(0.0)))

    # Two scalar divides per sample replace per-element divides (EUP relief).
    inv_mx = jnp.float32(1.0) / (sx * inv_n)
    inv_my = jnp.float32(1.0) / (sy * inv_n)

    def abs_body(i, acc):
        s = pl.multiple_of(i * chunk, chunk)
        xc = x_ref[0, pl.ds(s, chunk), :].astype(jnp.float32)
        yc = y_ref[0, pl.ds(s, chunk), :].astype(jnp.float32)
        return acc + jnp.sum(jnp.abs(xc * inv_mx - yc * inv_my))

    total = lax.fori_loop(0, n_chunks, abs_body, jnp.float32(0.0))
    o_ref[...] = total.reshape(1, 1, 1)


def _single_pass_abs_sum(xf, yf, n_true):
    B, M, _ = xf.shape
    chunk = _pick_divisor(M, 512)
    kernel = functools.partial(_single_pass_kernel, n_true=n_true,
                               chunk=chunk, n_chunks=M // chunk)
    partials = pl.pallas_call(
        kernel,
        out_shape=jax.ShapeDtypeStruct((B, 1, 1), jnp.float32),
        grid=(B,),
        in_specs=[
            pl.BlockSpec((1, M, _LANE), lambda b: (b, 0, 0)),
            pl.BlockSpec((1, M, _LANE), lambda b: (b, 0, 0)),
        ],
        out_specs=pl.BlockSpec((1, 1, 1), lambda b: (b, 0, 0)),
        compiler_params=pltpu.CompilerParams(
            dimension_semantics=("parallel",),       # batch sharded on v7x
            vmem_limit_bytes=_VMEM_LIMIT_BYTES,
        ),
    )(xf, yf)
    # Per-sample partials reduced here (better rounding than one running scalar).
    return jnp.sum(partials)


# ---------------------------------------------------------------------------
# Path 2: two-phase streaming for samples too big to hold resident in VMEM.
# ---------------------------------------------------------------------------
def _sums_kernel(x_ref, y_ref, sx_ref, sy_ref):
    c = pl.program_id(1)

    @pl.when(c == 0)
    def _():
        sx_ref[...] = jnp.zeros_like(sx_ref)
        sy_ref[...] = jnp.zeros_like(sy_ref)

    sx_ref[...] += jnp.sum(x_ref[...].astype(jnp.float32))
    sy_ref[...] += jnp.sum(y_ref[...].astype(jnp.float32))


def _absdiff_kernel(inv_ref, x_ref, y_ref, o_ref):
    b = pl.program_id(0)
    c = pl.program_id(1)

    @pl.when(c == 0)
    def _():
        o_ref[...] = jnp.zeros_like(o_ref)

    inv_mx = inv_ref[b, 0]          # scalar read from SMEM
    inv_my = inv_ref[b, 1]
    x = x_ref[...].astype(jnp.float32)
    y = y_ref[...].astype(jnp.float32)
    o_ref[...] += jnp.sum(jnp.abs(x * inv_mx - y * inv_my))


def _two_phase_abs_sum(xf, yf, n_true):
    B, M, _ = xf.shape
    tm = _pick_divisor(M, 1024)
    if tm != M and tm % 8 != 0:
        # Awkward sublane count: zero-pad (exact for this op) to a clean tile.
        mp = ((M + 511) // 512) * 512
        xf = jnp.pad(xf, ((0, 0), (0, mp - M), (0, 0)))
        yf = jnp.pad(yf, ((0, 0), (0, mp - M), (0, 0)))
        M, tm = mp, 512
    n_chunks = M // tm

    data_spec = pl.BlockSpec((1, tm, _LANE), lambda b, c: (b, c, 0))
    acc_spec = pl.BlockSpec((1, 1, 1), lambda b, c: (b, 0, 0))
    params = pltpu.CompilerParams(
        dimension_semantics=("parallel", "arbitrary"),
        vmem_limit_bytes=_VMEM_LIMIT_BYTES,
    )

    # Phase 1: per-sample sums (fused x/y sums, one streaming pass).
    sx, sy = pl.pallas_call(
        _sums_kernel,
        out_shape=(jax.ShapeDtypeStruct((B, 1, 1), jnp.float32),
                   jax.ShapeDtypeStruct((B, 1, 1), jnp.float32)),
        grid=(B, n_chunks),
        in_specs=[data_spec, data_spec],
        out_specs=(acc_spec, acc_spec),
        compiler_params=params,
    )(xf, yf)

    inv_n = jnp.float32(1.0 / n_true)
    inv_means = jnp.stack(
        [1.0 / (sx[:, 0, 0] * inv_n), 1.0 / (sy[:, 0, 0] * inv_n)], axis=-1
    ).astype(jnp.float32)                                  # (B, 2)

    # Phase 2: stream again, accumulate |x*inv_mx - y*inv_my| per sample.
    partials = pl.pallas_call(
        _absdiff_kernel,
        out_shape=jax.ShapeDtypeStruct((B, 1, 1), jnp.float32),
        grid=(B, n_chunks),
        in_specs=[
            pl.BlockSpec(memory_space=pltpu.MemorySpace.SMEM),  # inv_means
            data_spec,
            data_spec,
        ],
        out_specs=acc_spec,
        compiler_params=params,
    )(inv_means, xf, yf)
    return jnp.sum(partials)


# ---------------------------------------------------------------------------
# Public wrapper.
# ---------------------------------------------------------------------------
def shift_invariant_loss(x, y, *, force_two_phase=False):
    """x, y: (B, C, H, W) arrays. Returns scalar f32 loss (L1 mean reduction)."""
    assert x.shape == y.shape and x.ndim == 4, "expected NCHW inputs of equal shape"
    B = x.shape[0]
    n_true = int(x.shape[1] * x.shape[2] * x.shape[3])

    # Flatten each sample and zero-pad to a lane multiple.  Zero padding is
    # exact here: means use the true element count and |0*inv - 0*inv| = 0.
    xf = x.reshape(B, -1)
    yf = y.reshape(B, -1)
    pad = (-n_true) % _LANE
    if pad:
        xf = jnp.pad(xf, ((0, 0), (0, pad)))
        yf = jnp.pad(yf, ((0, 0), (0, pad)))
    M = (n_true + pad) // _LANE
    xf = xf.reshape(B, M, _LANE)
    yf = yf.reshape(B, M, _LANE)

    sample_bytes = n_true * x.dtype.itemsize
    if (not force_two_phase) and sample_bytes <= _SINGLE_PASS_MAX_SAMPLE_BYTES:
        abs_sum = _single_pass_abs_sum(xf, yf, n_true)
    else:
        abs_sum = _two_phase_abs_sum(xf, yf, n_true)

    # L1Loss default reduction='mean' -> divide by total element count.
    return (abs_sum / jnp.float32(B * n_true)).astype(jnp.float32)


def _reference(x, y):
    x = x.astype(jnp.float32)
    y = y.astype(jnp.float32)
    m_x = jnp.mean(x, axis=(1, 2, 3), keepdims=True)
    m_y = jnp.mean(y, axis=(1, 2, 3), keepdims=True)
    return jnp.mean(jnp.abs(x / m_x - y / m_y))


if __name__ == "__main__":
    key = jax.random.PRNGKey(0)
    kx, ky = jax.random.split(key)
    B, C, H, W = 2, 4, 16, 16
    # keep values positive so per-sample means are well away from zero
    x = jax.random.uniform(kx, (B, C, H, W), jnp.float32, minval=0.5, maxval=2.0)
    y = jax.random.uniform(ky, (B, C, H, W), jnp.float32, minval=0.5, maxval=2.0)

    ref = jax.block_until_ready(_reference(x, y))

    out = jax.block_until_ready(shift_invariant_loss(x, y))
    assert jnp.allclose(out, ref, rtol=1e-5, atol=1e-6), (out, ref)

    # Also exercise the large-sample streaming path on the same small inputs.
    out2 = jax.block_until_ready(shift_invariant_loss(x, y, force_two_phase=True))
    assert jnp.allclose(out2, ref, rtol=1e-5, atol=1e-6), (out2, ref)

    print("KERNEL_OK")
</pallas_src>

<mosaic_0001>
module attributes {stable_mosaic.version = 11 : i64} {
  func.func @_single_pass_kernel(%arg0: i32, %arg1: memref<1x8x128xf32, #tpu.memory_space<vmem>>, %arg2: memref<1x8x128xf32, #tpu.memory_space<vmem>>, %arg3: memref<1x1x1xf32, #tpu.memory_space<vmem>>) attributes {dimension_semantics = [#tpu.dimension_semantics<parallel>], iteration_bounds = array<i64: 2>, scalar_prefetch = 0 : i64, scratch_operands = 0 : i64, tpu.core_type = #tpu.core_type<tc>, window_params = [{transform_indices = @transform_0, window_bounds = array<i64: 1, 8, 128>}, {transform_indices = @transform_1, window_bounds = array<i64: 1, 8, 128>}, {transform_indices = @transform_2, window_bounds = array<i64: 1, 1, 1>}]} {
    %cst = arith.constant 0.000000e+00 : f32
    %cst_0 = arith.constant 0.000000e+00 : f32
    %c0_i32 = arith.constant 0 : i32
    %c8_i32 = arith.constant 8 : i32
    %0 = arith.muli %c0_i32, %c8_i32 : i32
    %1 = tpu.assume_multiple %0, 8 : i32
    %c0 = arith.constant 0 : index
    %2 = arith.index_cast %1 : i32 to index
    %c0_1 = arith.constant 0 : index
    %3 = vector.load %arg1[%c0, %2, %c0_1] : memref<1x8x128xf32, #tpu.memory_space<vmem>>, vector<1x8x128xf32>
    %4 = vector.shape_cast %3 : vector<1x8x128xf32> to vector<8x128xf32>
    %c0_2 = arith.constant 0 : index
    %5 = arith.index_cast %1 : i32 to index
    %c0_3 = arith.constant 0 : index
    %6 = vector.load %arg2[%c0_2, %5, %c0_3] : memref<1x8x128xf32, #tpu.memory_space<vmem>>, vector<1x8x128xf32>
    %7 = vector.shape_cast %6 : vector<1x8x128xf32> to vector<8x128xf32>
    %8 = vector.shape_cast %4 : vector<8x128xf32> to vector<1x8x128xf32>
    %cst_4 = arith.constant dense<0.000000e+00> : vector<1xf32>
    %9 = vector.multi_reduction <add>, %8, %cst_4 [1, 2] : vector<1x8x128xf32> to vector<1xf32>
    %10 = vector.shape_cast %9 : vector<1xf32> to vector<1x1x1xf32>
    %11 = vector.extract %10[0, 0, 0] : f32 from vector<1x1x1xf32>
    %12 = arith.addf %cst, %11 : f32
    %13 = vector.shape_cast %7 : vector<8x128xf32> to vector<1x8x128xf32>
    %cst_5 = arith.constant dense<0.000000e+00> : vector<1xf32>
    %14 = vector.multi_reduction <add>, %13, %cst_5 [1, 2] : vector<1x8x128xf32> to vector<1xf32>
    %15 = vector.shape_cast %14 : vector<1xf32> to vector<1x1x1xf32>
    %16 = vector.extract %15[0, 0, 0] : f32 from vector<1x1x1xf32>
    %17 = arith.addf %cst_0, %16 : f32
    %c1_i32 = arith.constant 1 : i32
    %cst_6 = arith.constant 9.765625E-4 : f32
    %18 = arith.mulf %12, %cst_6 : f32
    %cst_7 = arith.constant 1.000000e+00 : f32
    %19 = arith.divf %cst_7, %18 : f32
    %cst_8 = arith.constant 9.765625E-4 : f32
    %20 = arith.mulf %17, %cst_8 : f32
    %cst_9 = arith.constant 1.000000e+00 : f32
    %21 = arith.divf %cst_9, %20 : f32
    %cst_10 = arith.constant 0.000000e+00 : f32
    %c0_i32_11 = arith.constant 0 : i32
    %c8_i32_12 = arith.constant 8 : i32
    %22 = arith.muli %c0_i32_11, %c8_i32_12 : i32
    %23 = tpu.assume_multiple %22, 8 : i32
    %c0_13 = arith.constant 0 : index
    %24 = arith.index_cast %23 : i32 to index
    %c0_14 = arith.constant 0 : index
    %25 = vector.load %arg1[%c0_13, %24, %c0_14] : memref<1x8x128xf32, #tpu.memory_space<vmem>>, vector<1x8x128xf32>
    %26 = vector.shape_cast %25 : vector<1x8x128xf32> to vector<8x128xf32>
    %c0_15 = arith.constant 0 : index
    %27 = arith.index_cast %23 : i32 to index
    %c0_16 = arith.constant 0 : index
    %28 = vector.load %arg2[%c0_15, %27, %c0_16] : memref<1x8x128xf32, #tpu.memory_space<vmem>>, vector<1x8x128xf32>
    %29 = vector.shape_cast %28 : vector<1x8x128xf32> to vector<8x128xf32>
    %30 = vector.broadcast %19 : f32 to vector<8x128xf32>
    %31 = arith.mulf %26, %30 : vector<8x128xf32>
    %32 = vector.broadcast %21 : f32 to vector<8x128xf32>
    %33 = arith.mulf %29, %32 : vector<8x128xf32>
    %34 = arith.subf %31, %33 : vector<8x128xf32>
    %35 = math.absf %34 : vector<8x128xf32>
    %36 = vector.shape_cast %35 : vector<8x128xf32> to vector<1x8x128xf32>
    %cst_17 = arith.constant dense<0.000000e+00> : vector<1xf32>
    %37 = vector.multi_reduction <add>, %36, %cst_17 [1, 2] : vector<1x8x128xf32> to vector<1xf32>
    %38 = vector.shape_cast %37 : vector<1xf32> to vector<1x1x1xf32>
    %39 = vector.extract %38[0, 0, 0] : f32 from vector<1x1x1xf32>
    %40 = arith.addf %cst_10, %39 : f32
    %c1_i32_18 = arith.constant 1 : i32
    %41 = vector.broadcast %40 : f32 to vector<1x1x1xf32>
    %c0_19 = arith.constant 0 : index
    %c0_20 = arith.constant 0 : index
    %c0_21 = arith.constant 0 : index
    %42 = vector.load %arg3[%c0_19, %c0_20, %c0_21] : memref<1x1x1xf32, #tpu.memory_space<vmem>>, vector<1x1x1xf32>
    tpu.vector_store %arg3[%c0_19, %c0_20, %c0_21], %41 {strides = array<i32>} : memref<1x1x1xf32, #tpu.memory_space<vmem>>, vector<1x1x1xf32>,
    return
  }
  func.func @transform_0(%arg0: i32) -> (i32, i32, i32) {
    %c0_i32 = arith.constant 0 : i32
    %c0_i32_0 = arith.constant 0 : i32
    %c0_i32_1 = arith.constant 0 : i32
    return %arg0, %c0_i32, %c0_i32_0 : i32, i32, i32
  }
  func.func @transform_1(%arg0: i32) -> (i32, i32, i32) {
    %c0_i32 = arith.constant 0 : i32
    %c0_i32_0 = arith.constant 0 : i32
    %c0_i32_1 = arith.constant 0 : i32
    return %arg0, %c0_i32, %c0_i32_0 : i32, i32, i32
  }
  func.func @transform_2(%arg0: i32) -> (i32, i32, i32) {
    %c0_i32 = arith.constant 0 : i32
    %c0_i32_0 = arith.constant 0 : i32
    %c0_i32_1 = arith.constant 0 : i32
    return %arg0, %c0_i32, %c0_i32_0 : i32, i32, i32
  }
}

</mosaic_0001>

<bundles_post_ra>
// kernel: tpu_custom_call.1
= control target key start
LH: loop header
LB: loop body
LE: loop exit
PB: predicated region body
PF: predicated region fallthrough
CT: control target
= control target key end

     0   :  { %7 = vsyncpa [#allocation3], 0  ;;  %s660_s0 = inlined_call_operand.hbm [shape: f32[2,8,128], index: 0, kind: input, shape index: {}]   ;;  %s661_s1 = inlined_call_operand.hbm [shape: f32[2,8,128], index: 1, kind: input, shape index: {}]   ;;  %s662_s2 = inlined_call_operand.vmem [shape: f32[2,1,1], index: 2, kind: output, shape index: {}]  }
   0x1   :  { %9 = vsyncpa [#allocation3 + $0x1], 0 }
   0x2   :  { %10 = vsyncpa [#allocation5], 0 }
   0x3   :  { %12 = vsyncpa [#allocation5 + $0x1], 0  ;;  %s508_s9 = smov 0   ;;  %s510_s10 = smov 0  }
   0x4   :  { %s512_s11 = smov 0   ;;  %s514_s12 = smov 0  }
   0x5 LB: > { %s527_s13 = sadd.s32 4294967295, %s489_s12   ;;  %s530_s14 = sadd.s32 1, %s489_s12   ;;  %s489_s12 = sphi %s514_s12, %s674_s12   ;;  %s485_s11 = sphi %s512_s11, %s673_s11   ;;  %s481_s10 = sphi %s510_s10, %s672_s10   ;;  %s477_s9 = sphi %s508_s9, %s671_s9  }
   0x6   : > { %s22_s15 = ssub.s32 %s489_s12, %s530_s14  ;;  %s25_s16 = sadd.s32 1, %s485_s11 }
   0x7   : > { %p23_p0 = scmp.eq.s32.totalorder %s22_s15, 0  ;;  %p32_p1 = scmp.ne.s32.totalorder %s485_s11, %s481_s10 }
   0x8   : > { %p33_p2 = scmp.eq.s32.totalorder %s489_s12, 0  ;;  %p38_p3 = scmp.ne.s32.totalorder %s481_s10, %s477_s9 }
   0x9   : > { %s540_s17 = scalar_select %p23_p0, %s485_s11, %s25_s16  }
   0xa   : > { %p34_p4 = por %p33_p2, %p32_p1  ;;  %p39_p5 = scmp.eq.s32.totalorder %s527_s13, 0 }
   0xb   : > { %p358_p6 = scmp.lt.s32.totalorder %s489_s12, 2  ;;  %s549_s19 = sand.u32 1, %s485_s11  }
   0xc   : > { %p544_p7 = por %p39_p5, %p38_p3  ;;  %s328_s20 = sshll.u32 %s549_s19, 3 }
   0xd   : > { %s329_s21 = sshll.u32 %s489_s12, 7  ;;  %s118_s25 = scalar_lea.vmem [#allocation2], %s328_s20 }
   0xe   : > { %s664_s18 = scalar_select %p544_p7, 1, 0 }
   0xf   : > { %s558_s24 = scalar_lea.hbm %s660_s0, %s329_s21  ;;  %s125_s26 = sshll.u32 %s118_s25, 4  ;;  %s562_s26 = int_to_ptr.vmem [resolvable:$true] %s125_s26 }
  0x10   : > { %p564_p8 = pnand %p358_p6, %p34_p4  ;;  %s115_s28 = scalar_lea.sflag [#allocation3], %s549_s19 }
  0x11   : > { %s395_s29 = scalar_lea.hbm %s558_s24, 128  ;;  %s400_s4 = scalar_lea.hbm %s660_s0, 256 }
  0x12   : > { %p396_p11 = scmp.ne.s32.totalorder %s558_s24, %s395_s29  ;;  %p397_p12 = pneg %p564_p8 }
  0x13   : > { %p401_p1 = scmp.lt.s32.totalorder %s558_s24, %s660_s0  ;;  %p402_p2 = scmp.lt.s32.totalorder %s400_s4, %s395_s29 }
  0x14   : > { %p398_p13 = pnand %p397_p12, %p396_p11 }
  0x15   : > { %p403_p3 = por %p402_p2, %p401_p1 }
  0x16   : > { %p399_p0 = pneg %p398_p13 }
  0x18   : > { %p404_p4 = pnand %p403_p3, %p399_p0 }
  0x1a   : > { %407 = shalt.err (!%p404_p4)
}
  0x1b   : > { %s408_s7 = scalar_lea.vmem %s562_s26, 128  ;;  %s491_s8 = smov [#allocation2]  }
  0x1c   : > { %p409_p5 = scmp.ne.s32.totalorder %s562_s26, %s408_s7  ;;  %s413_s9 = sshll.u32 %s491_s8, 4  ;;  %s414_s9 = int_to_ptr.vmem [resolvable:$false] %s413_s9 }
  0x1d   : > { %s415_s15 = scalar_lea.vmem %s414_s9, 256  ;;  %p416_p13 = scmp.lt.s32.totalorder %s562_s26, %s414_s9 }
  0x1e   : > { %p411_p6 = pnand %p409_p5, %p397_p12  ;;  %p417_p9 = scmp.lt.s32.totalorder %s415_s15, %s408_s7 }
  0x20   : > { %p412_p11 = pneg %p411_p6  ;;  %p418_p10 = por %p417_p9, %p416_p13 }
  0x22   : > { %p419_p1 = pnand %p418_p10, %p412_p11 }
  0x24   : > { %422 = shalt.err (!%p419_p1)
}
  0x25   : > { %354 = dma.hbm_to_vmem [thread:$0]  (!%p564_p8), %s558_s24, 128, %s562_s26, %s115_s28  }
  0x26   : > { %p666_p0 = scmp.lt.s32.totalorder %s489_s12, 3  ;;  %p667_p2 = scmp.ge.s32.totalorder %s489_s12, 1 }
  0x27   : > { %s608_s25 = scalar_lea.hbm %s661_s1, %s329_s21  ;;  %s136_s29 = scalar_lea.vmem [#allocation4], %s328_s20 }
  0x28   : > { %p599_p3 = pnand %p667_p2, %p666_p0  ;;  %s143_s30 = sshll.u32 %s136_s29, 4  ;;  %s144_s30 = int_to_ptr.vmem [resolvable:$true] %s143_s30 }
  0x29   : > { %s133_s24 = scalar_lea.sflag [#allocation5], %s549_s19  ;;  %s423_s26 = scalar_lea.hbm %s608_s25, 128 }
  0x2a   : > { %s668_s16 = scalar_select %p599_p3, 1, 0 }
  0x2b   : > { %p424_p9 = scmp.ne.s32.totalorder %s608_s25, %s423_s26  ;;  %s428_s3 = scalar_lea.hbm %s661_s1, 256 }
  0x2c   : > { %p429_p5 = scmp.lt.s32.totalorder %s608_s25, %s661_s1  ;;  %p430_p6 = scmp.lt.s32.totalorder %s428_s3, %s423_s26 }
  0x2d   : > { %p426_p10 = pnand %p424_p9, %p397_p12 }
  0x2e   : > { %p431_p11 = por %p430_p6, %p429_p5 }
  0x2f   : > { %p427_p4 = pneg %p426_p10 }
  0x31   : > { %p432_p13 = pnand %p431_p11, %p427_p4 }
  0x33   : > { %435 = shalt.err (!%p432_p13)
}
  0x34   : > { %s436_s20 = scalar_lea.vmem %s144_s30, 128  ;;  %s492_s19 = smov [#allocation4]  }
  0x35   : > { %p437_p1 = scmp.ne.s32.totalorder %s144_s30, %s436_s20  ;;  %s441_s5 = sshll.u32 %s492_s19, 4  ;;  %s442_s5 = int_to_ptr.vmem [resolvable:$false] %s441_s5 }
  0x36   : > { %s443_s6 = scalar_lea.vmem %s442_s5, 256  ;;  %p444_p9 = scmp.lt.s32.totalorder %s144_s30, %s442_s5 }
  0x37   : > { %p439_p0 = pnand %p437_p1, %p397_p12  ;;  %p445_p10 = scmp.lt.s32.totalorder %s443_s6, %s436_s20 }
  0x39   : > { %p440_p2 = pneg %p439_p0  ;;  %p446_p7 = por %p445_p10, %p444_p9 }
  0x3b   : > { %p447_p3 = pnand %p446_p7, %p440_p2 }
  0x3d   : > { %450 = shalt.err (!%p447_p3)
}
  0x3e   : > { %357 = dma.hbm_to_vmem [thread:$0]  (!%p564_p8), %s608_s25, 128, %s144_s30, %s133_s24  }
  0x3f   : > { %p669_p4 = scmp.ne.s32.totalorder %s668_s16, 0 }
  0x40   : > { %s154_s7 = sand.u32 (!%p669_p4), 1, %s481_s10   ;;  %p670_p12 = scmp.ne.s32.totalorder (!%p669_p4), %s664_s18, 0 }
  0x41   : > { %152 = sbr.rel (%p669_p4) target bundleno = 554 (0x22a), region = 28  ;;  %s333_s8 = sshll.u32 (!%p669_p4), %s154_s7, 3 }
  0x42   : > { %s155_s9 = scalar_lea.sflag (!%p669_p4), [#allocation3], %s154_s7  ;;  %s158_s15 = scalar_lea.vmem (!%p669_p4), [#allocation2], %s333_s8 }
  0x46   : > { %468 = dma.done.wait (%p670_p12), %s155_s9, 128  }
  0x47   : > { %470 = vsyncadd (%p670_p12), %s155_s9, 4294967168  ;;  %s164_s22 = scalar_lea.sflag [#allocation5], %s154_s7  ;;  %s167_s23 = scalar_lea.vmem [#allocation4], %s333_s8 }
  0x48   : > { %472 = dma.done.wait (%p670_p12), %s164_s22, 128  }
  0x49   : > { %474 = vsyncadd (%p670_p12), %s164_s22, 4294967168  ;;  %v194_v0 = vld [vmem:[%s158_s15] sm:$0xff]  ;;  %v195_v1 = vld [vmem:[%s167_s23] sm:$0xff]  ;;  %p191_p7 = scmp.lt.s32.totalorder %s527_s13, 1  ;;  %vm241_vm0 = vcmask 0  }
  0x4a   : > { %196 = vadd.xlane.f32.xlu0 %v194_v0 }
  0x4b   : > { %s676_s13 = smov (!%p191_p7, %s527_s13), 1 }
  0x4c   : > { %s193_s12 = scalar_lea.vmem %s662_s2, %s676_s13 }
  0x4e   : > { %206 = vadd.xlane.f32.xlu0 %v195_v1 }
  0xd3   : > { %v197_v2 = vpop.xlane.xlu0 %196 }
  0xd4   : > { %v198_v3 = vrot.slane %v197_v2, 4 }
  0xd6   : > { %v199_v4 = vadd.f32 %v198_v3, %v197_v2 }
  0xd7   : > { %v207_v5 = vpop.xlane.xlu0 %206 }
  0xd8   : > { %v200_v6 = vrot.slane %v199_v4, 2  ;;  %v208_v7 = vrot.slane %v207_v5, 4 }
  0xda   : > { %v209_v8 = vadd.f32 %v208_v7, %v207_v5  ;;  %v201_v9 = vadd.f32 %v200_v6, %v199_v4 }
  0xdc   : > { %v210_v10 = vrot.slane %v209_v8, 2  ;;  %v202_v11 = vrot.slane %v201_v9, 1 }
  0xde   : > { %v211_v12 = vadd.f32 %v210_v10, %v209_v8  ;;  %v203_v13 = vadd.f32 %v202_v11, %v201_v9 }
  0xe0   : > { %337 = vpush %v203_v13  ;;  %v212_v14 = vrot.slane %v211_v12, 1 }
  0xe2   : > { %v213_v15 = vadd.f32 %v212_v14, %v211_v12 }
  0xe4   : > { %339 = vpush %v213_v15 }
 0x111   : > { %s338_s18 = spop %337 }
 0x112   : > { %s216_s27 = smul.f32 0.0009765625, %s338_s18 }
 0x114   : > { %v217_v16 = vstv %s216_s27 }
 0x115   : > { %391 = vrcp.f32 %v217_v16  ;;  %s340_s16 = spop %339 }
 0x116   : > { %s220_s25 = smul.f32 0.0009765625, %s340_s16 }
 0x118   : > { %v221_v17 = vstv %s220_s25 }
 0x119   : > { %393 = vrcp.f32 %v221_v17 }
 0x122   : > { %v392_v18 = vpop.eup %391 }
 0x123   : > { %341 = vpush %v392_v18 }
 0x126   : > { %v394_v19 = vpop.eup %393 }
 0x127   : > { %343 = vpush %v394_v19 }
 0x154   : > { %s342_s29 = spop %341 }
 0x155   : > { %v224_v20 = vstv %s342_s29 }
 0x156   : > { %v225_v22 = vmul.f32 %v224_v20, %v194_v0 }
 0x158   : > { %s344_s30 = spop %343 }
 0x159   : > { %v226_v21 = vstv %s344_s30 }
 0x15a   : > { %v227_v23 = vmul.f32 %v226_v21, %v195_v1 }
 0x15c   : > { %v228_v24 = vsub.f32 %v225_v22, %v227_v23 }
 0x15e   : > { %v229_v25 = vand.u32 2147483647, %v228_v24 }
 0x160   : > { %230 = vadd.xlane.f32.xlu1 %v229_v25 }
 0x1e9   : > { %v231_v26 = vpop.xlane.xlu1 %230 }
 0x1ea   : > { %v232_v27 = vrot.slane %v231_v26, 4 }
 0x1ec   : > { %v233_v28 = vadd.f32 %v232_v27, %v231_v26 }
 0x1ee   : > { %v234_v29 = vrot.slane %v233_v28, 2 }
 0x1f0   : > { %v235_v30 = vadd.f32 %v234_v29, %v233_v28 }
 0x1f2   : > { %v236_v31 = vrot.slane %v235_v30, 1 }
 0x1f4   : > { %v237_v32 = vadd.f32 %v236_v31, %v235_v30 }
 0x1f6   : > { %345 = vpush %v237_v32 }
 0x227   : > { %s346_s28 = spop %345 }
 0x228   : > { %v240_v33 = vstv %s346_s28 }
 0x229   : > { %242 = vst.msk [vmem:[%s193_s12] sm:$0x1] %vm241_vm0, %v240_v33 }
 0x22a PF: > { %p15_p8 = scmp.ge.s32.totalorder %s530_s14, 4   ;;  %s671_s9 = smov %s481_s10 }
 0x22b   : > { %s672_s10 = smov %s485_s11  ;;  %s673_s11 = smov %s540_s17 }
 0x22c   : > { %s674_s12 = smov %s530_s14  ;;  %17 = sbr.rel (!%p15_p8) target bundleno = 5 (0x5), region = 81 }
 0x231   :  { %260 = vsyncpa [#allocation3], 1 }
 0x232   :  { %262 = vsyncpa [#allocation3 + $0x1], 1 }
 0x233   :  { %263 = vsyncpa [#allocation5], 1 }
 0x234   :  { %265 = vsyncpa [#allocation5 + $0x1], 1 }

</bundles_post_ra>
